<compile_context>
chip_gen: v6e
topology: v6e:2x2x1
jax: 0.10.0
libtpu: 0.0.40
codegen_flags: <defaults>
</compile_context>

<pallas_src>
import jax
import jax.numpy as jnp
from jax.experimental import pallas as pl
from jax.experimental.pallas import tpu as pltpu


# ----------------------------------------------------------------------------
# Kernel
# ----------------------------------------------------------------------------
def se_kernel(x_ref, w1_ref, b1_ref, w2_ref, b2_ref, o_ref):
    # x_ref: (TB, C, L)   w1_ref: (C, Cr) f32   b1_ref: (1, Cr) f32
    # w2_ref: (Cr, C) f32 b2_ref: (1, C) f32    o_ref: (TB, C, L)
    x = x_ref[...]                                              # (TB, C, L), x.dtype
    tb, c, l = x.shape

    # --- squeeze: global average pool over L, f32 accumulation, no f32 copy ---
    y = jnp.sum(x, axis=-1, dtype=jnp.float32) * jnp.float32(1.0 / l)   # (TB, C)

    # --- excitation: Linear -> ReLU -> Linear -> Sigmoid (M = TB on the MXU) --
    h = jnp.dot(y, w1_ref[...], preferred_element_type=jnp.float32) + b1_ref[...]
    h = jnp.maximum(h, 0.0)                                     # (TB, Cr)
    s = jnp.dot(h, w2_ref[...], preferred_element_type=jnp.float32) + b2_ref[...]
    s = jax.nn.sigmoid(s)                                       # (TB, C) f32

    # --- scale: implicit lane-broadcast of the gate; store in x.dtype ---------
    o_ref[...] = x * s[:, :, None].astype(x.dtype)


# ----------------------------------------------------------------------------
# Wrapper
# ----------------------------------------------------------------------------
_MIN_TILE_DMA_BYTES = 2 * 1024 * 1024     # keep each grid step's DMA >= ~2 MiB
_TARGET_GRID_STEPS = 4                    # >= 2 steps per v7x TensorCore
_VMEM_HEADROOM_BYTES = 8 * 1024 * 1024


def _vmem_capacity_bytes(default=64 * 1024 * 1024):
    """Physical per-core VMEM; conservative 64 MiB (v7x) fallback."""
    try:
        info = pltpu.get_tpu_info()
        cap = getattr(info, "vmem_capacity_bytes", None)
        if cap:
            return int(cap)
    except Exception:
        pass
    return default


def _padded_2d_bytes(shape, itemsize=4):
    """Bytes of a 2-D block after (8, 128) tile padding."""
    rows = -(-shape[0] // 8) * 8
    cols = -(-shape[1] // 128) * 128
    return rows * cols * itemsize


def se_forward(x, w1, b1, w2, b2, *, donate_input=False, max_rows_per_step=None):
    """SE forward.  x: (B, C, L).  PyTorch Linear layout:
       w1: (Cr, C), b1: (Cr,), w2: (C, Cr), b2: (C,)."""
    B, C, L = x.shape
    Cr = w1.shape[0]
    itemsize = jnp.dtype(x.dtype).itemsize

    # ---- parameters: transpose + cast to f32 once (tiny, one-time XLA op) ----
    w1_t = w1.T.astype(jnp.float32)                # (C, Cr)  -> kernel does y @ W1^T
    w2_t = w2.T.astype(jnp.float32)                # (Cr, C)
    b1_2d = b1.reshape(1, Cr).astype(jnp.float32)
    b2_2d = b2.reshape(1, C).astype(jnp.float32)

    weight_bytes = (
        _padded_2d_bytes(w1_t.shape) + _padded_2d_bytes(b1_2d.shape)
        + _padded_2d_bytes(w2_t.shape) + _padded_2d_bytes(b2_2d.shape)
    )

    # ---- per-generation VMEM budget ------------------------------------------
    vmem_cap = _vmem_capacity_bytes()
    vmem_limit = (vmem_cap * 7) // 8               # ~56 MiB v7x, ~112 MiB v5e/v6e
    tile_budget = max(
        4 * 1024 * 1024,
        vmem_limit - 2 * weight_bytes - _VMEM_HEADROOM_BYTES,
    )

    # ---- choose the batch tile TB --------------------------------------------
    # Per grid step Pallas double-buffers the input and output tiles:
    #   resident ~= 2 * (in tile + out tile) = 4 * TB * C * L * itemsize
    bytes_per_row = C * L * itemsize
    max_tb_vmem = max(1, tile_budget // (4 * bytes_per_row))

    if max_rows_per_step is not None:
        TB = max(1, min(int(max_rows_per_step), B))
    else:
        # Aim for >= _TARGET_GRID_STEPS steps so DMA-in/DMA-out overlap (and both
        # v7x cores get >= 2 steps), but never drop a step's DMA below ~2 MiB.
        tb_for_steps = pl.cdiv(B, _TARGET_GRID_STEPS)
        tb_min_dma = max(1, _MIN_TILE_DMA_BYTES // bytes_per_row)
        tb_target = max(tb_for_steps, tb_min_dma)
        TB = max(1, min(max_tb_vmem, tb_target, B))

    grid = (pl.cdiv(B, TB),)                       # ragged last block is fine

    # ---- advisory cost estimate (memory-bound) --------------------------------
    cost = pl.CostEstimate(
        flops=int(4 * B * C * Cr + 2 * B * C * L),        # two tiny matmuls + pool + rescale
        transcendentals=int(B * C),                        # sigmoid
        bytes_accessed=int(2 * B * C * L * itemsize + 4 * weight_bytes),
    )

    return pl.pallas_call(
        se_kernel,
        out_shape=jax.ShapeDtypeStruct((B, C, L), x.dtype),
        grid_spec=pltpu.PrefetchScalarGridSpec(
            num_scalar_prefetch=0,
            grid=grid,
            in_specs=[
                pl.BlockSpec((TB, C, L), lambda b: (b, 0, 0)),   # x: TB batch rows / step
                pl.BlockSpec((C, Cr), lambda b: (0, 0)),         # W1^T (resident)
                pl.BlockSpec((1, Cr), lambda b: (0, 0)),         # b1
                pl.BlockSpec((Cr, C), lambda b: (0, 0)),         # W2^T (resident)
                pl.BlockSpec((1, C), lambda b: (0, 0)),          # b2
            ],
            out_specs=pl.BlockSpec((TB, C, L), lambda b: (b, 0, 0)),
        ),
        compiler_params=pltpu.CompilerParams(
            dimension_semantics=("parallel",),
            vmem_limit_bytes=int(vmem_limit),
        ),
        cost_estimate=cost,
        input_output_aliases=({0: 0} if donate_input else {}),
    )(x, w1_t, b1_2d, w2_t, b2_2d)


# ----------------------------------------------------------------------------
# Pure-JAX reference (matches the PyTorch forward)
# ----------------------------------------------------------------------------
def se_reference(x, w1, b1, w2, b2):
    y = jnp.mean(x, axis=-1)                       # (B, C)
    h = jnp.maximum(y @ w1.T + b1, 0.0)            # (B, Cr)
    s = jax.nn.sigmoid(h @ w2.T + b2)              # (B, C)
    return x * s[:, :, None]


if __name__ == "__main__":
    # SE(dim=32, factor=4) on (B, C, L) inputs.  L = 128 keeps the output store
    # lane-dense for the demo shape.
    B, C, L = 16, 32, 128
    factor = 4
    Cr = C // factor

    key = jax.random.PRNGKey(0)
    kx, k1, k2, k3, k4 = jax.random.split(key, 5)

    x = jax.random.normal(kx, (B, C, L), dtype=jnp.float32)
    # PyTorch Linear parameter shapes: (out_features, in_features)
    w1 = jax.random.normal(k1, (Cr, C), dtype=jnp.float32) * 0.1
    b1 = jax.random.normal(k2, (Cr,), dtype=jnp.float32) * 0.1
    w2 = jax.random.normal(k3, (C, Cr), dtype=jnp.float32) * 0.1
    b2 = jax.random.normal(k4, (C,), dtype=jnp.float32) * 0.1

    ref = se_reference(x, w1, b1, w2, b2)

    # Default auto-tiled path.
    out = jax.block_until_ready(se_forward(x, w1, b1, w2, b2))
    assert out.shape == (B, C, L)
    assert jnp.allclose(out, ref, atol=1e-5, rtol=1e-5), "mismatch vs reference"

    # Exercise the cdiv / ragged-last-block path: TB=3 does not divide B=16.
    out_ragged = jax.block_until_ready(
        se_forward(x, w1, b1, w2, b2, max_rows_per_step=3))
    assert jnp.allclose(out_ragged, ref, atol=1e-5, rtol=1e-5), "ragged-grid mismatch"

    print("KERNEL_OK")
</pallas_src>

<mosaic_0001>
module attributes {stable_mosaic.version = 11 : i64} {
  func.func @se_kernel(%arg0: i32, %arg1: memref<16x32x128xf32, #tpu.memory_space<vmem>>, %arg2: memref<32x8xf32, #tpu.memory_space<vmem>>, %arg3: memref<1x8xf32, #tpu.memory_space<vmem>>, %arg4: memref<8x32xf32, #tpu.memory_space<vmem>>, %arg5: memref<1x32xf32, #tpu.memory_space<vmem>>, %arg6: memref<16x32x128xf32, #tpu.memory_space<vmem>>) attributes {dimension_semantics = [#tpu.dimension_semantics<parallel>], iteration_bounds = array<i64: 1>, scalar_prefetch = 0 : i64, scratch_operands = 0 : i64, tpu.core_type = #tpu.core_type<tc>, window_params = [{transform_indices = @transform_0, window_bounds = array<i64: 16, 32, 128>}, {pipeline_mode = #tpu.pipeline_mode<synchronous>, transform_indices = @transform_1, window_bounds = array<i64: 32, 8>}, {pipeline_mode = #tpu.pipeline_mode<synchronous>, transform_indices = @transform_2, window_bounds = array<i64: 1, 8>}, {pipeline_mode = #tpu.pipeline_mode<synchronous>, transform_indices = @transform_3, window_bounds = array<i64: 8, 32>}, {pipeline_mode = #tpu.pipeline_mode<synchronous>, transform_indices = @transform_4, window_bounds = array<i64: 1, 32>}, {transform_indices = @transform_5, window_bounds = array<i64: 16, 32, 128>}]} {
    %c0 = arith.constant 0 : index
    %c0_0 = arith.constant 0 : index
    %c0_1 = arith.constant 0 : index
    %0 = vector.load %arg1[%c0, %c0_0, %c0_1] : memref<16x32x128xf32, #tpu.memory_space<vmem>>, vector<16x32x128xf32>
    %cst = arith.constant dense<0.000000e+00> : vector<16x32xf32>
    %1 = vector.multi_reduction <add>, %0, %cst [2] : vector<16x32x128xf32> to vector<16x32xf32>
    %cst_2 = arith.constant 7.812500e-03 : f32
    %2 = vector.broadcast %cst_2 : f32 to vector<16x32xf32>
    %3 = arith.mulf %1, %2 : vector<16x32xf32>
    %c0_3 = arith.constant 0 : index
    %c0_4 = arith.constant 0 : index
    %4 = vector.load %arg2[%c0_3, %c0_4] : memref<32x8xf32, #tpu.memory_space<vmem>>, vector<32x8xf32>
    %cst_5 = arith.constant dense<0.000000e+00> : vector<16x8xf32>
    %5 = tpu.matmul %3, %4, %cst_5 {dimension_numbers = #tpu.dot_dimension_numbers<[1], [0], [0], [1], [0, 0, 1, 1], [], []>} : vector<16x32xf32>, vector<32x8xf32>, vector<16x8xf32> -> vector<16x8xf32>
    %c0_6 = arith.constant 0 : index
    %c0_7 = arith.constant 0 : index
    %6 = vector.load %arg3[%c0_6, %c0_7] : memref<1x8xf32, #tpu.memory_space<vmem>>, vector<1x8xf32>
    %7 = vector.broadcast %6 : vector<1x8xf32> to vector<16x8xf32>
    %8 = arith.addf %5, %7 : vector<16x8xf32>
    %cst_8 = arith.constant 0.000000e+00 : f32
    %9 = vector.broadcast %cst_8 : f32 to vector<16x8xf32>
    %10 = arith.maximumf %8, %9 : vector<16x8xf32>
    %c0_9 = arith.constant 0 : index
    %c0_10 = arith.constant 0 : index
    %11 = vector.load %arg4[%c0_9, %c0_10] : memref<8x32xf32, #tpu.memory_space<vmem>>, vector<8x32xf32>
    %cst_11 = arith.constant dense<0.000000e+00> : vector<16x32xf32>
    %12 = tpu.matmul %10, %11, %cst_11 {dimension_numbers = #tpu.dot_dimension_numbers<[1], [0], [0], [1], [0, 0, 1, 1], [], []>} : vector<16x8xf32>, vector<8x32xf32>, vector<16x32xf32> -> vector<16x32xf32>
    %c0_12 = arith.constant 0 : index
    %c0_13 = arith.constant 0 : index
    %13 = vector.load %arg5[%c0_12, %c0_13] : memref<1x32xf32, #tpu.memory_space<vmem>>, vector<1x32xf32>
    %14 = vector.broadcast %13 : vector<1x32xf32> to vector<16x32xf32>
    %15 = arith.addf %12, %14 : vector<16x32xf32>
    %16 = arith.negf %15 : vector<16x32xf32>
    %17 = math.exp %16 : vector<16x32xf32>
    %cst_14 = arith.constant 1.000000e+00 : f32
    %18 = vector.broadcast %cst_14 : f32 to vector<16x32xf32>
    %19 = arith.addf %18, %17 : vector<16x32xf32>
    %20 = arith.divf %18, %19 : vector<16x32xf32>
    %21 = vector.shape_cast %20 : vector<16x32xf32> to vector<16x32x1xf32>
    %22 = vector.broadcast %21 : vector<16x32x1xf32> to vector<16x32x128xf32>
    %23 = arith.mulf %0, %22 : vector<16x32x128xf32>
    %c0_15 = arith.constant 0 : index
    %c0_16 = arith.constant 0 : index
    %c0_17 = arith.constant 0 : index
    %24 = vector.load %arg6[%c0_15, %c0_16, %c0_17] : memref<16x32x128xf32, #tpu.memory_space<vmem>>, vector<16x32x128xf32>
    tpu.vector_store %arg6[%c0_15, %c0_16, %c0_17], %23 {strides = array<i32>} : memref<16x32x128xf32, #tpu.memory_space<vmem>>, vector<16x32x128xf32>,
    return
  }
  func.func @transform_0(%arg0: i32) -> (i32, i32, i32) {
    %c0_i32 = arith.constant 0 : i32
    %c0_i32_0 = arith.constant 0 : i32
    %c0_i32_1 = arith.constant 0 : i32
    return %arg0, %c0_i32, %c0_i32_0 : i32, i32, i32
  }
  func.func @transform_1(%arg0: i32) -> (i32, i32) {
    %c0_i32 = arith.constant 0 : i32
    %c0_i32_0 = arith.constant 0 : i32
    %c0_i32_1 = arith.constant 0 : i32
    return %c0_i32, %c0_i32_0 : i32, i32
  }
  func.func @transform_2(%arg0: i32) -> (i32, i32) {
    %c0_i32 = arith.constant 0 : i32
    %c0_i32_0 = arith.constant 0 : i32
    %c0_i32_1 = arith.constant 0 : i32
    return %c0_i32, %c0_i32_0 : i32, i32
  }
  func.func @transform_3(%arg0: i32) -> (i32, i32) {
    %c0_i32 = arith.constant 0 : i32
    %c0_i32_0 = arith.constant 0 : i32
    %c0_i32_1 = arith.constant 0 : i32
    return %c0_i32, %c0_i32_0 : i32, i32
  }
  func.func @transform_4(%arg0: i32) -> (i32, i32) {
    %c0_i32 = arith.constant 0 : i32
    %c0_i32_0 = arith.constant 0 : i32
    %c0_i32_1 = arith.constant 0 : i32
    return %c0_i32, %c0_i32_0 : i32, i32
  }
  func.func @transform_5(%arg0: i32) -> (i32, i32, i32) {
    %c0_i32 = arith.constant 0 : i32
    %c0_i32_0 = arith.constant 0 : i32
    %c0_i32_1 = arith.constant 0 : i32
    return %arg0, %c0_i32, %c0_i32_0 : i32, i32, i32
  }
}

</mosaic_0001>

<bundles_post_ra>
// kernel: tpu_custom_call.1
= control target key start
LH: loop header
LB: loop body
LE: loop exit
PB: predicated region body
PF: predicated region fallthrough
CT: control target
= control target key end

     0   :  { %10 = vsyncpa [#allocation3], 0  ;;  %s1885_s0 = inlined_call_operand.hbm [shape: f32[16,32,128], index: 0, kind: input, shape index: {}]   ;;  %s1886_s1 = inlined_call_operand.vmem [shape: f32[32,8], index: 1, kind: input, shape index: {}]   ;;  %s1887_s2 = inlined_call_operand.vmem [shape: f32[1,8], index: 2, kind: input, shape index: {}]   ;;  %s1888_s3 = inlined_call_operand.vmem [shape: f32[8,32], index: 3, kind: input, shape index: {}]   ;;  %s1889_s4 = inlined_call_operand.vmem [shape: f32[1,32], index: 4, kind: input, shape index: {}]   ;;  %s1890_s5 = inlined_call_operand.hbm [shape: f32[16,32,128], index: 5, kind: output, shape index: {}]  }
   0x1   :  { %11 = vsyncpa [#allocation4], 0  ;;  %s1468_s18 = smov [#allocation2]  }
   0x2   :  { %s17_s19 = sshll.u32 %s1468_s18, 4  ;;  %s18_s19 = int_to_ptr.vmem [resolvable:$true] %s17_s19 }
   0x3   :  { %s1432_s20 = scalar_lea.vmem %s18_s19, 8192  ;;  %p1437_p1 = scmp.lt.s32.totalorder %s18_s19, %s18_s19 }
   0x4   :  { %p1433_p0 = scmp.ne.s32.totalorder %s18_s19, %s1432_s20  ;;  %p1438_p2 = scmp.lt.s32.totalorder %s1432_s20, %s1432_s20 }
   0x6   :  { %p1439_p3 = por %p1438_p2, %p1437_p1 }
   0x8   :  { %p1440_p4 = pnand %p1439_p3, %p1433_p0 }
   0xa   :  { %1443 = shalt.err (!%p1440_p4)
}
   0xb   :  { %s1469_s21 = smov 128   ;;  %s1470_s22 = smov 8  }
   0xc   :  { %23 = dma.hbm_to_vmem [thread:$0]  %s1885_s0, 8192, %s18_s19, [#allocation3], %s1469_s21, %s1469_s21, %s1470_s22  }
   0xd   :  { %1464 = dma.done.wait [#allocation3], 8192  }
   0xe   :  { %1465 = vsyncadd [#allocation3], 4294959104  ;;  %v39_v0 = vld [vmem:[#allocation2 + $0x20] sm:$0xff]  ;;  %v40_v2 = vld [vmem:[#allocation2 + $0x28] sm:$0xff]  ;;  %vm377_vm0 = vcmask 130112   ;;  %vm384_vm1 = vcmask 195712  }
   0xf   :  { %v35_v1 = vld [vmem:[#allocation2] sm:$0xff]  ;;  %107 = vadd.xlane.f32.xlu1 %v39_v0  ;;  %v36_v3 = vld [vmem:[#allocation2 + $0x8] sm:$0xff]  ;;  %v41_v4 = vld [vmem:[#allocation2 + $0x30] sm:$0xff]  ;;  %vm391_vm2 = vcmask 261312   ;;  %vm678_vm3 = vcmask 1041409   ;;  %vm680_vm4 = vcmask 1042434  }
  0x10   :  { %99 = vadd.xlane.f32.xlu0 %v35_v1  ;;  %v37_v5 = vld [vmem:[#allocation2 + $0x10] sm:$0xff]  ;;  %v44_v6 = vld [vmem:[#allocation2 + $0x48] sm:$0xff]  ;;  %v43_v7 = vld [vmem:[#allocation2 + $0x40] sm:$0xff]  ;;  %vm682_vm5 = vcmask 1043459   ;;  %vm684_vm6 = vcmask 1044484   ;;  %vm686_vm7 = vcmask 1045509  }
  0x11   :  { %v68_v8 = vld [vmem:[#allocation2 + $0x108] sm:$0xff]  ;;  %v67_v9 = vld [vmem:[#allocation2 + $0x100] sm:$0xff]  ;;  %v42_v12 = vld [vmem:[#allocation2 + $0x38] sm:$0xff]  ;;  %vm688_vm8 = vcmask 1046534   ;;  %vm690_vm9 = vcmask 1047559   ;;  %vm699_vm10 = vcmask 261120  }
  0x12   :  { %v72_v10 = vld [vmem:[#allocation2 + $0x128] sm:$0xff]  ;;  %v71_v11 = vld [vmem:[#allocation2 + $0x120] sm:$0xff]  ;;  %v38_v13 = vld [vmem:[#allocation2 + $0x18] sm:$0xff]  ;;  %vm789_vm11 = vcmask 64512  }
  0x13   :  { %109 = vadd.xlane.f32.xlu1 %v40_v2  ;;  %v47_v14 = vld [vmem:[#allocation2 + $0x60] sm:$0xff]  ;;  %v45_v15 = vld [vmem:[#allocation2 + $0x50] sm:$0xff]  ;;  %v48_v17 = vld [vmem:[#allocation2 + $0x68] sm:$0xff] }
  0x14   :  { %101 = vadd.xlane.f32.xlu0 %v36_v3  ;;  %v1508_v16 = vld [vmem:[#allocation2 + $0x110] sm:$0xff]  ;;  %v75_v18 = vld [vmem:[#allocation2 + $0x140] sm:$0xff]  ;;  %v46_v20 = vld [vmem:[#allocation2 + $0x58] sm:$0xff] }
  0x15   :  { %v73_v19 = vld [vmem:[#allocation2 + $0x130] sm:$0xff]  ;;  %v76_v21 = vld [vmem:[#allocation2 + $0x148] sm:$0xff]  ;;  %v51_v22 = vld [vmem:[#allocation2 + $0x80] sm:$0xff] }
  0x16   :  { %v49_v23 = vld [vmem:[#allocation2 + $0x70] sm:$0xff]  ;;  %v1511_v24 = vld [vmem:[#allocation2 + $0x118] sm:$0xff]  ;;  %v52_v25 = vld [vmem:[#allocation2 + $0x88] sm:$0xff] }
  0x17   :  { %111 = vadd.xlane.f32.xlu1 %v41_v4  ;;  %v77_v26 = vld [vmem:[#allocation2 + $0x150] sm:$0xff]  ;;  %v1514_v27 = vld [vmem:[#allocation2 + $0x138] sm:$0xff]  ;;  %v80_v28 = vld [vmem:[#allocation2 + $0x168] sm:$0xff] }
  0x18   :  { %103 = vadd.xlane.f32.xlu0 %v37_v5  ;;  %v79_v29 = vld [vmem:[#allocation2 + $0x160] sm:$0xff]  ;;  %v53_v30 = vld [vmem:[#allocation2 + $0x90] sm:$0xff]  ;;  %v50_v31 = vld [vmem:[#allocation2 + $0x78] sm:$0xff] }
  0x19   :  { %v56_v32 = vld [vmem:[#allocation2 + $0xa8] sm:$0xff]  ;;  %v55_v33 = vld [vmem:[#allocation2 + $0xa0] sm:$0xff]  ;;  %v81_v34 = vld [vmem:[#allocation2 + $0x170] sm:$0xff] }
  0x1a   :  { %v1517_v35 = vld [vmem:[#allocation2 + $0x158] sm:$0xff]  ;;  %v84_v36 = vld [vmem:[#allocation2 + $0x188] sm:$0xff]  ;;  %v83_v37 = vld [vmem:[#allocation2 + $0x180] sm:$0xff] }
  0x1b   :  { %117 = vadd.xlane.f32.xlu1 %v44_v6  ;;  %v57_v38 = vld [vmem:[#allocation2 + $0xb0] sm:$0xff]  ;;  %v54_v39 = vld [vmem:[#allocation2 + $0x98] sm:$0xff]  ;;  %v60_v40 = vld [vmem:[#allocation2 + $0xc8] sm:$0xff] }
  0x1c   :  { %115 = vadd.xlane.f32.xlu0 %v43_v7  ;;  %v59_v41 = vld [vmem:[#allocation2 + $0xc0] sm:$0xff]  ;;  %v1520_v42 = vld [vmem:[#allocation2 + $0x190] sm:$0xff]  ;;  %v1522_v43 = vld [vmem:[#allocation2 + $0x178] sm:$0xff] }
  0x1d   :  { %1904 = vst [vmem:[#allocation8_spill] sm:$0xff] %v1520_v42  ;;  %1905 = vst [vmem:[#allocation9_spill] sm:$0xff] %v1522_v43  ;;  %v1526_v44 = vld [vmem:[#allocation2 + $0x1a8] sm:$0xff]  ;;  %v1528_v45 = vld [vmem:[#allocation2 + $0x1a0] sm:$0xff] }
  0x1e   :  { %1906 = vst [vmem:[#allocation10_spill] sm:$0xff] %v1526_v44  ;;  %1907 = vst [vmem:[#allocation11_spill] sm:$0xff] %v1528_v45  ;;  %v61_v46 = vld [vmem:[#allocation2 + $0xd0] sm:$0xff]  ;;  %v58_v47 = vld [vmem:[#allocation2 + $0xb8] sm:$0xff] }
  0x1f   :  { %165 = vadd.xlane.f32.xlu1 %v68_v8  ;;  %v64_v48 = vld [vmem:[#allocation2 + $0xe8] sm:$0xff]  ;;  %v63_v49 = vld [vmem:[#allocation2 + $0xe0] sm:$0xff]  ;;  %v1532_v50 = vld [vmem:[#allocation2 + $0x1b0] sm:$0xff] }
  0x20   :  { %163 = vadd.xlane.f32.xlu0 %v67_v9  ;;  %1908 = vst [vmem:[#allocation12_spill] sm:$0xff] %v1532_v50  ;;  %v1534_v51 = vld [vmem:[#allocation2 + $0x198] sm:$0xff]  ;;  %v1538_v52 = vld [vmem:[#allocation2 + $0x1c8] sm:$0xff]  ;;  %v1540_v53 = vld [vmem:[#allocation2 + $0x1c0] sm:$0xff] }
  0x21   :  { %1909 = vst [vmem:[#allocation13_spill] sm:$0xff] %v1534_v51  ;;  %1910 = vst [vmem:[#allocation14_spill] sm:$0xff] %v1538_v52  ;;  %v65_v54 = vld [vmem:[#allocation2 + $0xf0] sm:$0xff]  ;;  %v62_v55 = vld [vmem:[#allocation2 + $0xd8] sm:$0xff] }
  0x22   :  { %1911 = vst [vmem:[#allocation15_spill] sm:$0xff] %v1540_v53  ;;  %v1544_v56 = vld [vmem:[#allocation2 + $0x1d0] sm:$0xff]  ;;  %v1546_v57 = vld [vmem:[#allocation2 + $0x1b8] sm:$0xff]  ;;  %v1550_v58 = vld [vmem:[#allocation2 + $0x1e8] sm:$0xff] }
  0x23   :  { %173 = vadd.xlane.f32.xlu1 %v72_v10  ;;  %1912 = vst [vmem:[#allocation16_spill] sm:$0xff] %v1544_v56  ;;  %1913 = vst [vmem:[#allocation17_spill] sm:$0xff] %v1546_v57  ;;  %v1552_v59 = vld [vmem:[#allocation2 + $0x1e0] sm:$0xff]  ;;  %v1556_v60 = vld [vmem:[#allocation2 + $0x1d8] sm:$0xff] }
  0x24   :  { %171 = vadd.xlane.f32.xlu0 %v71_v11  ;;  %1914 = vst [vmem:[#allocation18_spill] sm:$0xff] %v1550_v58  ;;  %1915 = vst [vmem:[#allocation19_spill] sm:$0xff] %v1552_v59  ;;  %v66_v61 = vld [vmem:[#allocation2 + $0xf8] sm:$0xff]  ;;  %v97_v62 = vld [vmem:[#allocation2 + $0x1f0] sm:$0xff] }
  0x25   :  { %1916 = vst [vmem:[#allocation20_spill] sm:$0xff] %v1556_v60  ;;  %v98_v63 = vld [vmem:[#allocation2 + $0x1f8] sm:$0xff]  ;;  %v293_v1 = vld [vmem:[%s1886_s1 + $0x10] sm:$0xff]  ;;  %v292_v2 = vld [vmem:[%s1886_s1 + $0x8] sm:$0xff] }
  0x26   :  { %v294_v0 = vld [vmem:[%s1886_s1 + $0x18] sm:$0xff]  ;;  %v291_v5 = vld [vmem:[%s1886_s1] sm:$0xff] }
  0x27   :  { %113 = vadd.xlane.f32.xlu1 %v42_v12  ;;  %1349 = vmatprep.subr.mxu0 %v294_v0 }
  0x28   :  { %105 = vadd.xlane.f32.xlu0 %v38_v13  ;;  %1350 = vmatpush3.msra.mxu0 %v294_v0 }
  0x29   :  { %1351 = vmatprep.subr.mxu0 %v293_v1 }
  0x2a   :  { %1352 = vmatpush3.msra.mxu0 %v293_v1 }
  0x2b   :  { %123 = vadd.xlane.f32.xlu1 %v47_v14  ;;  %1353 = vmatprep.subr.mxu0 %v292_v2 }
  0x2c   :  { %119 = vadd.xlane.f32.xlu0 %v45_v15  ;;  %1354 = vmatpush3.msra.mxu0 %v292_v2 }
  0x2d   :  { %1355 = vmatprep.subr.mxu0 %v291_v5 }
  0x2e   :  { %1356 = vmatpush3.msra.mxu0 %v291_v5 }
  0x2f   :  { %167 = vadd.xlane.f32.xlu1 %v1508_v16 }
  0x30   :  { %125 = vadd.xlane.f32.xlu0 %v48_v17 }
  0x33   :  { %179 = vadd.xlane.f32.xlu1 %v75_v18 }
  0x34   :  { %175 = vadd.xlane.f32.xlu0 %v73_v19 }
  0x37   :  { %121 = vadd.xlane.f32.xlu1 %v46_v20 }
  0x38   :  { %181 = vadd.xlane.f32.xlu0 %v76_v21 }
  0x3b   :  { %131 = vadd.xlane.f32.xlu1 %v51_v22 }
  0x3c   :  { %127 = vadd.xlane.f32.xlu0 %v49_v23 }
  0x3f   :  { %169 = vadd.xlane.f32.xlu1 %v1511_v24 }
  0x40   :  { %133 = vadd.xlane.f32.xlu0 %v52_v25 }
  0x43   :  { %183 = vadd.xlane.f32.xlu1 %v77_v26 }
  0x44   :  { %177 = vadd.xlane.f32.xlu0 %v1514_v27 }
  0x47   :  { %189 = vadd.xlane.f32.xlu1 %v80_v28 }
  0x48   :  { %187 = vadd.xlane.f32.xlu0 %v79_v29 }
  0x4b   :  { %135 = vadd.xlane.f32.xlu1 %v53_v30 }
  0x4c   :  { %129 = vadd.xlane.f32.xlu0 %v50_v31 }
  0x4f   :  { %141 = vadd.xlane.f32.xlu1 %v56_v32 }
  0x50   :  { %139 = vadd.xlane.f32.xlu0 %v55_v33 }
  0x53   :  { %191 = vadd.xlane.f32.xlu1 %v81_v34 }
  0x54   :  { %185 = vadd.xlane.f32.xlu0 %v1517_v35 }
  0x57   :  { %197 = vadd.xlane.f32.xlu1 %v84_v36 }
  0x58   :  { %195 = vadd.xlane.f32.xlu0 %v83_v37 }
  0x5b   :  { %143 = vadd.xlane.f32.xlu1 %v57_v38 }
  0x5c   :  { %137 = vadd.xlane.f32.xlu0 %v54_v39 }
  0x5f   :  { %149 = vadd.xlane.f32.xlu1 %v60_v40 }
  0x60   :  { %147 = vadd.xlane.f32.xlu0 %v59_v41 }
  0x63   :  { %199 = vadd.xlane.f32.xlu1 %v1520_v42 }
  0x64   :  { %193 = vadd.xlane.f32.xlu0 %v1522_v43 }
  0x67   :  { %205 = vadd.xlane.f32.xlu1 %v1526_v44 }
  0x68   :  { %203 = vadd.xlane.f32.xlu0 %v1528_v45 }
  0x6b   :  { %151 = vadd.xlane.f32.xlu1 %v61_v46  ;;  %v366_v46 = vlaneseq }
  0x6c   :  { %145 = vadd.xlane.f32.xlu0 %v58_v47 }
  0x6f   :  { %157 = vadd.xlane.f32.xlu1 %v64_v48 }
  0x70   :  { %155 = vadd.xlane.f32.xlu0 %v63_v49  ;;  %v367_v49 = vand.u32 127, %v366_v46 }
  0x73   :  { %207 = vadd.xlane.f32.xlu1 %v1532_v50 }
  0x74   :  { %201 = vadd.xlane.f32.xlu0 %v1534_v51 }
  0x77   :  { %213 = vadd.xlane.f32.xlu1 %v1538_v52 }
  0x78   :  { %211 = vadd.xlane.f32.xlu0 %v1540_v53 }
  0x7b   :  { %159 = vadd.xlane.f32.xlu1 %v65_v54 }
  0x7c   :  { %153 = vadd.xlane.f32.xlu0 %v62_v55 }
  0x7f   :  { %215 = vadd.xlane.f32.xlu1 %v1544_v56 }
  0x80   :  { %209 = vadd.xlane.f32.xlu0 %v1546_v57 }
  0x83   :  { %221 = vadd.xlane.f32.xlu1 %v1550_v58 }
  0x84   :  { %219 = vadd.xlane.f32.xlu0 %v1552_v59 }
  0x87   :  { %217 = vadd.xlane.f32.xlu1 %v1556_v60  ;;  %v386_v60 = vadd.s32 4294967272, %v367_v49 }
  0x88   :  { %161 = vadd.xlane.f32.xlu0 %v66_v61  ;;  %v1623_v61 = vshrl.u32 %v366_v46, 7 }
  0x8a   :  { %v1630_v2 = vsub.s32 %v367_v49, %v1623_v61 }
  0x8b   :  { %225 = vadd.xlane.f32.xlu1 %v98_v63  ;;  %v379_v63 = vadd.s32 4294967280, %v367_v49 }
  0x8c   :  { %223 = vadd.xlane.f32.xlu0 %v97_v62  ;;  %v372_v62 = vadd.s32 4294967288, %v367_v49 }
  0x8d   :  { %v1636_v56 = vsub.s32 %v379_v63, %v1623_v61 }
  0x8e   :  { %v1633_v5 = vsub.s32 %v372_v62, %v1623_v61 }
  0x98   :  { %v108_v3 = vpop.xlane.xlu1 %107 }
  0x99   :  { %v100_v4 = vpop.xlane.xlu0 %99  ;;  %v231_v46 = vmul.f32 0.0078125, %v108_v3 }
  0x9a   :  { %v227_v53 = vmul.f32 0.0078125, %v100_v4 }
  0x9b   :  { %v396_v3 = vrot.slane %v231_v46, %v1630_v2 }
  0x9c   :  { %v110_v6 = vpop.xlane.xlu1 %109  ;;  %v371_v4 = vrot.slane %v227_v53, %v1630_v2 }
  0x9d   :  { %v102_v7 = vpop.xlane.xlu0 %101  ;;  %v232_v59 = vmul.f32 0.0078125, %v110_v6 }
  0x9e   :  { %v228_v58 = vmul.f32 0.0078125, %v102_v7  ;;  %v1645_v7 = vsub.s32 %v386_v60, %v1623_v61 }
  0x9f   :  { %v400_v62 = vrot.slane %v232_v59, %v1633_v5 }
  0xa0   :  { %v112_v8 = vpop.xlane.xlu1 %111  ;;  %v376_v6 = vrot.slane %v228_v58, %v1633_v5 }
  0xa1   :  { %v104_v9 = vpop.xlane.xlu0 %103  ;;  %v233_v52 = vmul.f32 0.0078125, %v112_v8  ;;  %v401_v46 = vsel %vm377_vm0, %v400_v62, %v396_v3 }
  0xa2   :  { %v229_v50 = vmul.f32 0.0078125, %v104_v9  ;;  %v378_v53 = vsel %vm377_vm0, %v376_v6, %v371_v4 }
  0xa3   :  { %v405_v8 = vrot.slane %v233_v52, %v1636_v56 }
  0xa4   :  { %v118_v10 = vpop.xlane.xlu1 %117  ;;  %v383_v9 = vrot.slane %v229_v50, %v1636_v56 }
  0xa5   :  { %v116_v11 = vpop.xlane.xlu0 %115  ;;  %v236_v44 = vmul.f32 0.0078125, %v118_v10  ;;  %v406_v51 = vsel %vm384_vm1, %v405_v8, %v401_v46 }
  0xa6   :  { %v235_v42 = vmul.f32 0.0078125, %v116_v11 }
  0xa7   :  { %v419_v59 = vrot.slane %v236_v44, %v1633_v5 }
  0xa8   :  { %v1571_v12 = vpop.xlane.xlu1 %165  ;;  %v415_v58 = vrot.slane %v235_v42, %v1630_v2 }
  0xa9   :  { %v1573_v13 = vpop.xlane.xlu0 %163  ;;  %v260_v52 = vmul.f32 0.0078125, %v1571_v12 }
  0xaa   :  { %v259_v43 = vmul.f32 0.0078125, %v1573_v13  ;;  %v420_v62 = vsel %vm377_vm0, %v419_v59, %v415_v58 }
  0xab   :  { %v533_v3 = vrot.slane %v260_v52, %v1633_v5 }
  0xac   :  { %v1575_v14 = vpop.xlane.xlu1 %173  ;;  %v529_v59 = vrot.slane %v259_v43, %v1630_v2 }
  0xad   :  { %v1577_v15 = vpop.xlane.xlu0 %171  ;;  %v264_v44 = vmul.f32 0.0078125, %v1575_v14 }
  0xae   :  { %v263_v42 = vmul.f32 0.0078125, %v1577_v15 }
  0xaf   :  { %v552_v58 = vrot.slane %v264_v44, %v1633_v5 }
  0xb0   :  { %v114_v17 = vpop.xlane.xlu1 %113 }
  0xb1   :  { %v106_v18 = vpop.xlane.xlu0 %105  ;;  %v234_v11 = vmul.f32 0.0078125, %v114_v17 }
  0xb2   :  { %v230_v63 = vmul.f32 0.0078125, %v106_v18 }
  0xb3   :  { %v410_v12 = vrot.slane %v234_v11, %v1645_v7 }
  0xb4   :  { %v1579_v19 = vpop.xlane.xlu1 %123 }
  0xb5   :  { %v120_v20 = vpop.xlane.xlu0 %119  ;;  %v239_v6 = vmul.f32 0.0078125, %v1579_v19  ;;  %v548_v19 = vrot.slane %v263_v42, %v1630_v2 }
  0xb6   :  { %v237_v60 = vmul.f32 0.0078125, %v120_v20  ;;  %v385_v20 = vsel %vm384_vm1, %v383_v9, %v378_v53 }
  0xb7   :  { %v434_v43 = vrot.slane %v239_v6, %v1630_v2  ;;  %v553_v6 = vsel %vm377_vm0, %v552_v58, %v548_v19 }
  0xb8   :  { %v1581_v21 = vpop.xlane.xlu1 %167  ;;  %v424_v13 = vrot.slane %v237_v60, %v1636_v56 }
  0xb9   :  { %v1583_v22 = vpop.xlane.xlu0 %125  ;;  %v261_v14 = vmul.f32 0.0078125, %v1581_v21 }
  0xba   :  { %v240_v15 = vmul.f32 0.0078125, %v1583_v22  ;;  %v411_v22 = vsel %vm391_vm2, %v410_v12, %v406_v51  ;;  %v425_v46 = vsel %vm384_vm1, %v424_v13, %v420_v62 }
  0xbb   :  { %v538_v53 = vrot.slane %v261_v14, %v1636_v56 }
  0xbc   :  { %v1585_v23 = vpop.xlane.xlu1 %179 }
  0xbd   :  { %v1587_v25 = vpop.xlane.xlu0 %175  ;;  %v267_v60 = vmul.f32 0.0078125, %v1585_v23 }
  0xbe   :  { %v265_v4 = vmul.f32 0.0078125, %v1587_v25 }
  0xbf   :  { %v567_v13 = vrot.slane %v267_v60, %v1630_v2 }
  0xc0   :  { %v122_v26 = vpop.xlane.xlu1 %121  ;;  %v557_v52 = vrot.slane %v265_v4, %v1636_v56 }
  0xc1   :  { %v1589_v28 = vpop.xlane.xlu0 %181  ;;  %v238_v50 = vmul.f32 0.0078125, %v122_v26  ;;  %v390_v26 = vrot.slane %v230_v63, %v1645_v7 }
  0xc2   :  { %v268_v9 = vmul.f32 0.0078125, %v1589_v28 }
  0xc3   :  { %v429_v8 = vrot.slane %v238_v50, %v1645_v7  ;;  %v392_v25 = vsel %vm391_vm2, %v390_v26, %v385_v20  ;;  %v534_v26 = vsel %vm377_vm0, %v533_v3, %v529_v59 }
  0xc4   :  { %v1591_v29 = vpop.xlane.xlu1 %131  ;;  %v571_v51 = vrot.slane %v268_v9, %v1633_v5  ;;  %v679_v14 = vsel %vm678_vm3, %v411_v22, %v392_v25 }
  0xc5   :  { %v1593_v30 = vpop.xlane.xlu0 %127  ;;  %v430_v50 = vsel %vm391_vm2, %v429_v8, %v425_v46  ;;  %v243_v44 = vmul.f32 0.0078125, %v1591_v29 }
  0xc6   :  { %v241_v11 = vmul.f32 0.0078125, %v1593_v30  ;;  %v438_v30 = vrot.slane %v240_v15, %v1633_v5  ;;  %v558_v15 = vsel %vm384_vm1, %v557_v52, %v553_v6  ;;  %v681_v4 = vsel %vm680_vm4, %v430_v50, %v679_v14 }
  0xc7   :  { %v572_v3 = vsel %vm377_vm0, %v571_v51, %v567_v13  ;;  %v453_v8 = vrot.slane %v243_v44, %v1630_v2 }
  0xc8   :  { %v1595_v31 = vpop.xlane.xlu1 %169  ;;  %v443_v23 = vrot.slane %v241_v11, %v1636_v56 }
  0xc9   :  { %v1597_v32 = vpop.xlane.xlu0 %133 }
  0xca   :  { %v244_v42 = vmul.f32 0.0078125, %v1597_v32  ;;  %v439_v32 = vsel %vm377_vm0, %v438_v30, %v434_v43 }
  0xcb   :  { %v444_v9 = vsel %vm384_vm1, %v443_v23, %v439_v32 }
  0xcc   :  { %v1599_v33 = vpop.xlane.xlu1 %183  ;;  %v457_v58 = vrot.slane %v244_v42, %v1633_v5 }
  0xcd   :  { %v1601_v34 = vpop.xlane.xlu0 %177  ;;  %v269_v20 = vmul.f32 0.0078125, %v1599_v33 }
  0xce   :  { %v266_v28 = vmul.f32 0.0078125, %v1601_v34  ;;  %v262_v34 = vmul.f32 0.0078125, %v1595_v31  ;;  %v539_v31 = vsel %vm384_vm1, %v538_v53, %v534_v26 }
  0xcf   :  { %v576_v19 = vrot.slane %v269_v20, %v1636_v56 }
  0xd0   :  { %v1603_v36 = vpop.xlane.xlu1 %189  ;;  %v562_v29 = vrot.slane %v266_v28, %v1645_v7  ;;  %v543_v59 = vrot.slane %v262_v34, %v1645_v7 }
  0xd1   :  { %v1605_v37 = vpop.xlane.xlu0 %187  ;;  %v272_v25 = vmul.f32 0.0078125, %v1603_v36  ;;  %v577_v44 = vsel %vm384_vm1, %v576_v19, %v572_v3 }
  0xd2   :  { %v563_v22 = vsel %vm391_vm2, %v562_v29, %v558_v15  ;;  %v271_v60 = vmul.f32 0.0078125, %v1605_v37  ;;  %v544_v37 = vsel %vm391_vm2, %v543_v59, %v539_v31 }
  0xd4   :  { %v1607_v38 = vpop.xlane.xlu1 %135 }
  0xd5   :  { %v1609_v39 = vpop.xlane.xlu0 %129  ;;  %v245_v28 = vmul.f32 0.0078125, %v1607_v38  ;;  %v458_v38 = vsel %vm377_vm0, %v457_v58, %v453_v8 }
  0xd6   :  { %v242_v33 = vmul.f32 0.0078125, %v1609_v39 }
  0xd8   :  { %v1611_v40 = vpop.xlane.xlu1 %141  ;;  %v448_v43 = vrot.slane %v242_v33, %v1645_v7 }
  0xd9   :  { %v1613_v41 = vpop.xlane.xlu0 %139  ;;  %v248_v46 = vmul.f32 0.0078125, %v1611_v40 }
  0xda   :  { %v247_v53 = vmul.f32 0.0078125, %v1613_v41 }
  0xdb   :  { %v476_v34 = vrot.slane %v248_v46, %v1633_v5 }
  0xdc   :  { %v1615_v47 = vpop.xlane.xlu1 %191  ;;  %v472_v42 = vrot.slane %v247_v53, %v1630_v2 }
  0xdd   :  { %v1617_v48 = vpop.xlane.xlu0 %185  ;;  %v273_v30 = vmul.f32 0.0078125, %v1615_v47  ;;  %v1745_v47 = vsel %vm678_vm3, %v563_v22, %v544_v37 }
  0xde   :  { %v270_v52 = vmul.f32 0.0078125, %v1617_v48  ;;  %v590_v48 = vrot.slane %v272_v25, %v1633_v5  ;;  %v477_v19 = vsel %vm377_vm0, %v476_v34, %v472_v42 }
  0xdf   :  { %v595_v20 = vrot.slane %v273_v30, %v1636_v56 }
  0xe0   :  { %v1619_v54 = vpop.xlane.xlu1 %197 }
  0xe1   :  { %v1621_v55 = vpop.xlane.xlu0 %195  ;;  %v276_v50 = vmul.f32 0.0078125, %v1619_v54  ;;  %v586_v54 = vrot.slane %v271_v60, %v1630_v2 }
  0xe2   :  { %v275_v51 = vmul.f32 0.0078125, %v1621_v55  ;;  %v462_v55 = vrot.slane %v245_v28, %v1636_v56 }
  0xe3   :  { %v609_v26 = vrot.slane %v276_v50, %v1633_v5  ;;  %v591_v3 = vsel %vm377_vm0, %v590_v48, %v586_v54 }
  0xe4   :  { %v1625_v0 = vpop.xlane.xlu1 %143  ;;  %v605_v6 = vrot.slane %v275_v51, %v1630_v2  ;;  %v463_v8 = vsel %vm384_vm1, %v462_v55, %v458_v38 }
  0xe5   :  { %v1627_v1 = vpop.xlane.xlu0 %137  ;;  %v249_v40 = vmul.f32 0.0078125, %v1625_v0  ;;  %v581_v0 = vrot.slane %v270_v52, %v1645_v7 }
  0xe6   :  { %v246_v36 = vmul.f32 0.0078125, %v1627_v1  ;;  %v449_v1 = vsel %vm391_vm2, %v448_v43, %v444_v9  ;;  %v610_v22 = vsel %vm377_vm0, %v609_v26, %v605_v6 }
  0xe7   :  { %v481_v29 = vrot.slane %v249_v40, %v1636_v56  ;;  %v683_v58 = vsel %vm682_vm5, %v449_v1, %v681_v4 }
  0xe8   :  { %v1638_v57 = vpop.xlane.xlu1 %149  ;;  %v467_v13 = vrot.slane %v246_v36, %v1645_v7 }
  0xe9   :  { %v1640_v45 = vpop.xlane.xlu0 %147  ;;  %v252_v14 = vmul.f32 0.0078125, %v1638_v57  ;;  %v596_v57 = vsel %vm384_vm1, %v595_v20, %v591_v3 }
  0xea   :  { %v251_v31 = vmul.f32 0.0078125, %v1640_v45  ;;  %v468_v25 = vsel %vm391_vm2, %v467_v13, %v463_v8 }
  0xeb   :  { %v495_v4 = vrot.slane %v252_v14, %v1633_v5  ;;  %v685_v36 = vsel %vm684_vm6, %v468_v25, %v683_v58 }
  0xec   :  { %v1651_v49 = vpop.xlane.xlu1 %199  ;;  %v491_v60 = vrot.slane %v251_v31, %v1630_v2 }
  0xed   :  { %v1653_v10 = vpop.xlane.xlu0 %193  ;;  %v277_v32 = vmul.f32 0.0078125, %v1651_v49  ;;  %v1771_v49 = vsel %vm391_vm2, %v581_v0, %v577_v44 }
  0xee   :  { %v274_v9 = vmul.f32 0.0078125, %v1653_v10 }
  0xef   :  { %v614_v28 = vrot.slane %v277_v32, %v1636_v56 }
  0xf0   :  { %v1664_v17 = vpop.xlane.xlu1 %205  ;;  %v600_v46 = vrot.slane %v274_v9, %v1645_v7 }
  0xf1   :  { %v1666_v18 = vpop.xlane.xlu0 %203  ;;  %v280_v45 = vmul.f32 0.0078125, %v1664_v17 }
  0xf2   :  { %v279_v10 = vmul.f32 0.0078125, %v1666_v18  ;;  %v601_v1 = vsel %vm391_vm2, %v600_v46, %v596_v57 }
  0xf3   :  { %v628_v18 = vrot.slane %v280_v45, %v1633_v5 }
  0xf4   :  { %v1684_v63 = vpop.xlane.xlu1 %151  ;;  %v624_v37 = vrot.slane %v279_v10, %v1630_v2 }
  0xf5   :  { %v1686_v21 = vpop.xlane.xlu0 %145  ;;  %v253_v53 = vmul.f32 0.0078125, %v1684_v63  ;;  %v496_v63 = vsel %vm377_vm0, %v495_v4, %v491_v60 }
  0xf6   :  { %v250_v59 = vmul.f32 0.0078125, %v1686_v21  ;;  %v482_v21 = vsel %vm384_vm1, %v481_v29, %v477_v19 }
  0xf7   :  { %v500_v34 = vrot.slane %v253_v53, %v1636_v56 }
  0xf8   :  { %v1704_v62 = vpop.xlane.xlu1 %157  ;;  %v486_v30 = vrot.slane %v250_v59, %v1645_v7 }
  0xf9   :  { %v1706_v12 = vpop.xlane.xlu0 %155  ;;  %v256_v52 = vmul.f32 0.0078125, %v1704_v62  ;;  %v615_v62 = vsel %vm384_vm1, %v614_v28, %v610_v22  ;;  %v501_v3 = vsel %vm384_vm1, %v500_v34, %v496_v63 }
  0xfa   :  { %v255_v50 = vmul.f32 0.0078125, %v1706_v12  ;;  %v487_v42 = vsel %vm391_vm2, %v486_v30, %v482_v21 }
  0xfb   :  { %v687_v59 = vsel %vm686_vm7, %v487_v42, %v685_v36 }
  0xfc   :  { %v1724_v11 = vpop.xlane.xlu1 %207 }
  0xfd   :  { %v1726_v39 = vpop.xlane.xlu0 %201  ;;  %v281_v38 = vmul.f32 0.0078125, %v1724_v11  ;;  %v514_v11 = vrot.slane %v256_v52, %v1633_v5 }
  0xfe   :  { %v278_v44 = vmul.f32 0.0078125, %v1726_v39  ;;  %v510_v39 = vrot.slane %v255_v50, %v1630_v2  ;;  %v693_v50 = vsel %vm680_vm4, %v1771_v49, %v1745_v47 }
  0xff   :  { %v633_v26 = vrot.slane %v281_v38, %v1636_v56  ;;  %v694_v36 = vsel %vm682_vm5, %v601_v1, %v693_v50 }
 0x100   :  { %v214_v41 = vpop.xlane.xlu1 %213  ;;  %v619_v6 = vrot.slane %v278_v44, %v1645_v7  ;;  %v515_v58 = vsel %vm377_vm0, %v514_v11, %v510_v39  ;;  %v1335_v39 = vld [vmem:[%s1889_s4] ss:$0 sm:$0xff] }
 0x101   :  { %v212_v23 = vpop.xlane.xlu0 %211  ;;  %v284_v40 = vmul.f32 0.0078125, %v214_v41 }
 0x102   :  { %v283_v48 = vmul.f32 0.0078125, %v212_v23  ;;  %v629_v23 = vsel %vm377_vm0, %v628_v18, %v624_v37  ;;  %v620_v25 = vsel %vm391_vm2, %v619_v6, %v615_v62  ;;  %v885_v6 = vsub.s32 0, %v1623_v61 }
 0x103   :  { %v647_v13 = vrot.slane %v284_v40, %v1633_v5  ;;  %v634_v22 = vsel %vm384_vm1, %v633_v26, %v629_v23  ;;  %v695_v40 = vsel %vm684_vm6, %v620_v25, %v694_v36  ;;  %v1378_v36 = vld [vmem:[#allocation2 + $0x100] sm:$0xff] }
 0x104   :  { %v160_v33 = vpop.xlane.xlu1 %159  ;;  %v643_v29 = vrot.slane %v283_v48, %v1630_v2 }
 0x105   :  { %v154_v15 = vpop.xlane.xlu0 %153  ;;  %v257_v54 = vmul.f32 0.0078125, %v160_v33 }
 0x106   :  { %v254_v51 = vmul.f32 0.0078125, %v154_v15  ;;  %v648_v4 = vsel %vm377_vm0, %v647_v13, %v643_v29 }
 0x107   :  { %v519_v14 = vrot.slane %v257_v54, %v1636_v56 }
 0x108   :  { %v216_v43 = vpop.xlane.xlu1 %215  ;;  %v505_v41 = vrot.slane %v254_v51, %v1645_v7 }
 0x109   :  { %v210_v17 = vpop.xlane.xlu0 %209  ;;  %v285_v20 = vmul.f32 0.0078125, %v216_v43  ;;  %v520_v46 = vsel %vm384_vm1, %v519_v14, %v515_v58  ;;  %v904_v14 = vsub.s32 1, %v1623_v61  ;;  %v961_v58 = vsub.s32 4, %v1623_v61 }
 0x10a   :  { %v282_v0 = vmul.f32 0.0078125, %v210_v17  ;;  %v506_v45 = vsel %vm391_vm2, %v505_v41, %v501_v3 }
 0x10b   :  { %v652_v19 = vrot.slane %v285_v20, %v1636_v56  ;;  %v689_v18 = vsel %vm688_vm8, %v506_v45, %v687_v59 }
 0x10c   :  { %v222_v55 = vpop.xlane.xlu1 %221  ;;  %v638_v57 = vrot.slane %v282_v0, %v1645_v7 }
 0x10d   :  { %v220_v12 = vpop.xlane.xlu0 %219  ;;  %v288_v31 = vmul.f32 0.0078125, %v222_v55  ;;  %v653_v51 = vsel %vm384_vm1, %v652_v19, %v648_v4  ;;  %v1018_v4 = vsub.s32 7, %v1623_v61 }
 0x10e   :  { %v287_v32 = vmul.f32 0.0078125, %v220_v12 }
 0x10f   :  { %v666_v60 = vrot.slane %v288_v31, %v1633_v5  ;;  %v639_v5 = vsel %vm391_vm2, %v638_v57, %v634_v22  ;;  %v980_v57 = vsub.s32 5, %v1623_v61 }
 0x110   :  { %v218_v33 = vpop.xlane.xlu1 %217  ;;  %v662_v28 = vrot.slane %v287_v32, %v1630_v2  ;;  %v696_v63 = vsel %vm686_vm7, %v639_v5, %v695_v40  ;;  %v923_v32 = vsub.s32 2, %v1623_v61  ;;  %v1377_v5 = vld [vmem:[#allocation2 + $0x108] sm:$0xff] }
 0x111   :  { %v162_v15 = vpop.xlane.xlu0 %161  ;;  %v286_v8 = vmul.f32 0.0078125, %v218_v33 }
 0x112   :  { %v258_v9 = vmul.f32 0.0078125, %v162_v15  ;;  %v667_v47 = vsel %vm377_vm0, %v666_v60, %v662_v28 }
 0x113   :  { %v657_v10 = vrot.slane %v286_v8, %v1645_v7 }
 0x114   :  { %v524_v21 = vrot.slane %v258_v9, %v1645_v7  ;;  %v226_v17 = vpop.xlane.xlu1 %225  ;;  %v942_v9 = vsub.s32 3, %v1623_v61 }
 0x115   :  { %v224_v43 = vpop.xlane.xlu0 %223  ;;  %v290_v30 = vmul.f32 0.0078125, %v226_v17  ;;  %v658_v37 = vsel %vm391_vm2, %v657_v10, %v653_v51  ;;  %v999_v10 = vsub.s32 6, %v1623_v61 }
 0x116   :  { %v289_v53 = vmul.f32 0.0078125, %v224_v43  ;;  %v525_v52 = vsel %vm391_vm2, %v524_v21, %v520_v46  ;;  %v697_v48 = vsel %vm688_vm8, %v658_v37, %v696_v63 }
 0x117   :  { %v691_v2 = vsel %vm690_vm9, %v525_v52, %v689_v18  ;;  %v676_v44 = vrot.slane %v290_v30, %v1645_v7  ;;  %v1332_v7 = vld [vmem:[%s1887_s2] ss:$0 sm:$0xff]  ;;  %s1471_s2 = smov [#allocation5]  }
 0x118   :  { %v671_v38 = vrot.slane %v289_v53, %v1636_v56  ;;  %1357 = vmatprep.mubr.msk.f32.mxu0 %vm699_vm10, %v691_v2  ;;  %v781_v56 = vld [vmem:[%s1888_s3] sm:$0xff]  ;;  %s1320_s3 = sshll.u32 %s1471_s2, 4  ;;  %s1321_s3 = int_to_ptr.vmem [resolvable:$true] %s1320_s3 }
 0x119   :  { %1360 = vmatprep.subr.mxu1 %v781_v56  ;;  %s1444_s4 = scalar_lea.vmem %s1321_s3, 8192  ;;  %p1449_p6 = scmp.lt.s32.totalorder %s1321_s3, %s1321_s3 }
 0x11a   :  { %v672_v49 = vsel %vm384_vm1, %v671_v38, %v667_v47  ;;  %1361 = vmatpush3.msra.mxu1 %v781_v56  ;;  %p1445_p5 = scmp.ne.s32.totalorder %s1321_s3, %s1444_s4  ;;  %p1450_p7 = scmp.lt.s32.totalorder %s1444_s4, %s1444_s4 }
 0x11b   :  { %v677_v62 = vsel %vm391_vm2, %v676_v44, %v672_v49 }
 0x11c   :  { %v698_v54 = vsel %vm690_vm9, %v677_v62, %v697_v48  ;;  %v1379_v62 = vld [vmem:[#allocation2 + $0x128] sm:$0xff]  ;;  %p1451_p8 = por %p1450_p7, %p1449_p6 }
 0x11d   :  { %1358 = vmatmul.mubr.msk.f32.vlgmr.msra.gmra.mxu0 %vm699_vm10, %v698_v54  ;;  %v1380_v54 = vld [vmem:[#allocation2 + $0x120] sm:$0xff] }
 0x11e   :  { %p1452_p9 = pnand %p1451_p8, %p1445_p5 }
 0x1dd   :  { %v1359_v55 = vpop.f32.mrf.mxu0 }
 0x1de   :  { %v776_v12 = vadd.f32 %v1359_v55, %v1332_v7 }
 0x1df   :  { %v770_v1 = vpop.f32.mrf.mxu0 }
 0x1e0   :  { %v771_v34 = vadd.f32 %v1332_v7, %v770_v1  ;;  %v780_v11 = vmax.f32 %v776_v12, 0.0  ;;  %v1381_v12 = vld [vmem:[#allocation2 + $0x130] sm:$0xff] }
 0x1e2   :  { %v779_v42 = vmax.f32 %v771_v34, 0.0 }
 0x1e4   :  { %1362 = vmatprep.mubr.msk.f32.mxu1 %vm789_vm11, %v779_v42  ;;  %v1382_v42 = vld [vmem:[#allocation2 + $0x148] sm:$0xff] }
 0x1e5   :  { %1363 = vmatmul.mubr.msk.f32.vlgmr.msra.gmra.mxu1 %vm789_vm11, %v780_v11 }
 0x2a5   :  { %v1364_v41 = vpop.f32.mrf.mxu1 }
 0x2a6   :  { %v868_v20 = vadd.f32 %v1364_v41, %v1335_v39 }
 0x2a7   :  { %v862_v33 = vpop.f32.mrf.mxu1 }
 0x2a8   :  { %v1339_v0 = vmul.f32 -1.442695, %v868_v20  ;;  %v863_v15 = vadd.f32 %v1335_v39, %v862_v33  ;;  %v1383_v39 = vld [vmem:[#allocation2 + $0x140] sm:$0xff] }
 0x2aa   :  { %1369 = vpow2.f32 %v1339_v0  ;;  %v1338_v8 = vmul.f32 -1.442695, %v863_v15 }
 0x2b7   :  { %v1370_v23 = vpop.eup %1369 }
 0x2b8   :  { %v878_v26 = vadd.f32 1.0, %v1370_v23 }
 0x2ba   :  { %1371 = vrcp.f32 %v878_v26  ;;  %v1384_v26 = vld [vmem:[#allocation2 + $0x150] sm:$0xff] }
 0x2bb   :  { %1373 = vpow2.f32 %v1338_v8 }
 0x2c7   :  { %v1372_v13 = vpop.eup %1371 }
 0x2c8   :  { %v1038_v29 = vrot.slane %v1372_v13, %v885_v6  ;;  %v1057_v31 = vrot.slane %v1372_v13, %v904_v14  ;;  %v1076_v3 = vrot.slane %v1372_v13, %v923_v32  ;;  %v1095_v59 = vrot.slane %v1372_v13, %v942_v9  ;;  %v1374_v45 = vpop.eup %1373 }
 0x2c9   :  { %v1114_v19 = vrot.slane %v1372_v13, %v961_v58  ;;  %v877_v22 = vadd.f32 1.0, %v1374_v45  ;;  %v1133_v25 = vrot.slane %v1372_v13, %v980_v57  ;;  %v1152_v21 = vrot.slane %v1372_v13, %v999_v10  ;;  %v1389_v45 = vld [vmem:[#allocation2 + $0x180] sm:$0xff] }
 0x2ca   :  { %1044 = vbcast.lane.b32.xlu1 %v1038_v29, 264  ;;  %1040 = vbcast.lane.b32.xlu0 %v1038_v29, 256  ;;  %v1856_v60 = vrot.slane %v1372_v13, %v1018_v4 }
 0x2cb   :  { %1375 = vrcp.f32 %v877_v22 }
 0x2ce   :  { %1052 = vbcast.lane.b32.xlu1 %v1038_v29, 280  ;;  %1048 = vbcast.lane.b32.xlu0 %v1038_v29, 272  ;;  %v1385_v29 = vld [vmem:[#allocation2 + $0x168] sm:$0xff] }
 0x2d2   :  { %1063 = vbcast.lane.b32.xlu1 %v1057_v31, 264  ;;  %1059 = vbcast.lane.b32.xlu0 %v1057_v31, 256 }
 0x2d6   :  { %1071 = vbcast.lane.b32.xlu1 %v1057_v31, 280  ;;  %1067 = vbcast.lane.b32.xlu0 %v1057_v31, 272  ;;  %v1386_v31 = vld [vmem:[#allocation2 + $0x160] sm:$0xff] }
 0x2d8   :  { %v1376_v28 = vpop.eup %1375 }
 0x2d9   :  { %v886_v43 = vrot.slane %v1376_v28, %v885_v6  ;;  %v905_v17 = vrot.slane %v1376_v28, %v904_v14  ;;  %v924_v46 = vrot.slane %v1376_v28, %v923_v32  ;;  %v943_v61 = vrot.slane %v1376_v28, %v942_v9  ;;  %v1387_v9 = vld [vmem:[#allocation2 + $0x170] sm:$0xff] }
 0x2da   :  { %1082 = vbcast.lane.b32.xlu1 %v1076_v3, 264  ;;  %1078 = vbcast.lane.b32.xlu0 %v1076_v3, 256  ;;  %v962_v53 = vrot.slane %v1376_v28, %v961_v58  ;;  %v981_v30 = vrot.slane %v1376_v28, %v980_v57  ;;  %v1000_v52 = vrot.slane %v1376_v28, %v999_v10 }
 0x2db   :  { %v1019_v18 = vrot.slane %v1376_v28, %v1018_v4 }
 0x2de   :  { %1090 = vbcast.lane.b32.xlu1 %v1076_v3, 280  ;;  %1086 = vbcast.lane.b32.xlu0 %v1076_v3, 272  ;;  %v1917_v3 = vld [vmem:[#allocation9_spill] sm:$0xff] }
 0x2e2   :  { %1101 = vbcast.lane.b32.xlu1 %v1095_v59, 264  ;;  %1097 = vbcast.lane.b32.xlu0 %v1095_v59, 256 }
 0x2e6   :  { %1109 = vbcast.lane.b32.xlu1 %v1095_v59, 280  ;;  %1105 = vbcast.lane.b32.xlu0 %v1095_v59, 272 }
 0x2ea   :  { %1120 = vbcast.lane.b32.xlu1 %v1114_v19, 264  ;;  %1116 = vbcast.lane.b32.xlu0 %v1114_v19, 256 }
 0x2ee   :  { %1128 = vbcast.lane.b32.xlu1 %v1114_v19, 280  ;;  %1124 = vbcast.lane.b32.xlu0 %v1114_v19, 272  ;;  %v1388_v19 = vld [vmem:[#allocation2 + $0x188] sm:$0xff] }
 0x2f2   :  { %1139 = vbcast.lane.b32.xlu1 %v1133_v25, 264  ;;  %1135 = vbcast.lane.b32.xlu0 %v1133_v25, 256 }
 0x2f6   :  { %1147 = vbcast.lane.b32.xlu1 %v1133_v25, 280  ;;  %1143 = vbcast.lane.b32.xlu0 %v1133_v25, 272 }
 0x2fa   :  { %1158 = vbcast.lane.b32.xlu1 %v1152_v21, 264  ;;  %1154 = vbcast.lane.b32.xlu0 %v1152_v21, 256 }
 0x2fe   :  { %1166 = vbcast.lane.b32.xlu1 %v1152_v21, 280  ;;  %1162 = vbcast.lane.b32.xlu0 %v1152_v21, 272  ;;  %v1918_v21 = vld [vmem:[#allocation13_spill] sm:$0xff] }
 0x302   :  { %1177 = vbcast.lane.b32.xlu1 %v1856_v60, 264  ;;  %1173 = vbcast.lane.b32.xlu0 %v1856_v60, 256 }
 0x306   :  { %892 = vbcast.lane.b32.xlu1 %v886_v43, 264  ;;  %888 = vbcast.lane.b32.xlu0 %v886_v43, 256 }
 0x30a   :  { %896 = vbcast.lane.b32.xlu1 %v886_v43, 272  ;;  %907 = vbcast.lane.b32.xlu0 %v905_v17, 256 }
 0x30e   :  { %900 = vbcast.lane.b32.xlu1 %v886_v43, 280  ;;  %915 = vbcast.lane.b32.xlu0 %v905_v17, 272 }
 0x312   :  { %911 = vbcast.lane.b32.xlu1 %v905_v17, 264  ;;  %926 = vbcast.lane.b32.xlu0 %v924_v46, 256 }
 0x316   :  { %919 = vbcast.lane.b32.xlu1 %v905_v17, 280  ;;  %934 = vbcast.lane.b32.xlu0 %v924_v46, 272 }
 0x31a   :  { %930 = vbcast.lane.b32.xlu1 %v924_v46, 264  ;;  %945 = vbcast.lane.b32.xlu0 %v943_v61, 256 }
 0x31e   :  { %938 = vbcast.lane.b32.xlu1 %v924_v46, 280  ;;  %953 = vbcast.lane.b32.xlu0 %v943_v61, 272  ;;  %v1920_v46 = vld [vmem:[#allocation10_spill] sm:$0xff] }
 0x322   :  { %949 = vbcast.lane.b32.xlu1 %v943_v61, 264  ;;  %964 = vbcast.lane.b32.xlu0 %v962_v53, 256 }
 0x326   :  { %957 = vbcast.lane.b32.xlu1 %v943_v61, 280  ;;  %972 = vbcast.lane.b32.xlu0 %v962_v53, 272 }
 0x32a   :  { %968 = vbcast.lane.b32.xlu1 %v962_v53, 264  ;;  %983 = vbcast.lane.b32.xlu0 %v981_v30, 256 }
 0x32e   :  { %976 = vbcast.lane.b32.xlu1 %v962_v53, 280  ;;  %991 = vbcast.lane.b32.xlu0 %v981_v30, 272  ;;  %v1921_v53 = vld [vmem:[#allocation11_spill] sm:$0xff] }
 0x332   :  { %987 = vbcast.lane.b32.xlu1 %v981_v30, 264  ;;  %1002 = vbcast.lane.b32.xlu0 %v1000_v52, 256 }
 0x336   :  { %995 = vbcast.lane.b32.xlu1 %v981_v30, 280  ;;  %1010 = vbcast.lane.b32.xlu0 %v1000_v52, 272 }
 0x33a   :  { %1006 = vbcast.lane.b32.xlu1 %v1000_v52, 264  ;;  %1021 = vbcast.lane.b32.xlu0 %v1019_v18, 256 }
 0x33c   :  { %v1045_v50 = vpop.permute.xlu1 %1044  ;;  %v1041_v51 = vpop.permute.xlu0 %1040 }
 0x33d   :  { %v1220_v2 = vmul.f32 %v1377_v5, %v1045_v50  ;;  %v1219_v37 = vmul.f32 %v1378_v36, %v1041_v51  ;;  %v1922_v50 = vld [vmem:[#allocation17_spill] sm:$0xff]  ;;  %v1923_v5 = vld [vmem:[#allocation12_spill] sm:$0xff] }
 0x33e   :  { %1014 = vbcast.lane.b32.xlu1 %v1000_v52, 280  ;;  %1029 = vbcast.lane.b32.xlu0 %v1019_v18, 272 }
 0x33f   :  { %1284 = vst [vmem:[#allocation5 + $0x108] sm:$0xff] %v1220_v2  ;;  %1283 = vst [vmem:[#allocation5 + $0x100] sm:$0xff] %v1219_v37 }
 0x340   :  { %v1053_v38 = vpop.permute.xlu1 %1052  ;;  %v1049_v44 = vpop.permute.xlu0 %1048 }
 0x341   :  { %v1222_v40 = vmul.f32 %v1053_v38, %v1511_v24  ;;  %v1221_v47 = vmul.f32 %v1049_v44, %v1508_v16  ;;  %v1924_v38 = vld [vmem:[#allocation14_spill] sm:$0xff] }
 0x342   :  { %1025 = vbcast.lane.b32.xlu1 %v1019_v18, 264  ;;  %1181 = vbcast.lane.b32.xlu0 %v1856_v60, 272 }
 0x343   :  { %1286 = vst [vmem:[#allocation5 + $0x118] sm:$0xff] %v1222_v40  ;;  %1285 = vst [vmem:[#allocation5 + $0x110] sm:$0xff] %v1221_v47  ;;  %v1925_v40 = vld [vmem:[#allocation15_spill] sm:$0xff] }
 0x344   :  { %v1064_v49 = vpop.permute.xlu1 %1063  ;;  %v1060_v63 = vpop.permute.xlu0 %1059 }
 0x345   :  { %v1224_v48 = vmul.f32 %v1379_v62, %v1064_v49  ;;  %v1223_v56 = vmul.f32 %v1380_v54, %v1060_v63  ;;  %v1926_v62 = vld [vmem:[#allocation20_spill] sm:$0xff] }
 0x346   :  { %1033 = vbcast.lane.b32.xlu1 %v1019_v18, 280  ;;  %v1927_v54 = vld [vmem:[#allocation16_spill] sm:$0xff] }
 0x347   :  { %1288 = vst [vmem:[#allocation5 + $0x128] sm:$0xff] %v1224_v48  ;;  %1287 = vst [vmem:[#allocation5 + $0x120] sm:$0xff] %v1223_v56 }
 0x348   :  { %v1072_v7 = vpop.permute.xlu1 %1071  ;;  %v1068_v55 = vpop.permute.xlu0 %1067 }
 0x349   :  { %v1226_v24 = vmul.f32 %v1072_v7, %v1514_v27  ;;  %v1225_v16 = vmul.f32 %v1381_v12, %v1068_v55 }
 0x34a   :  { %1185 = vbcast.lane.b32.xlu1 %v1856_v60, 280  ;;  %v1919_v60 = vld [vmem:[#allocation8_spill] sm:$0xff] }
 0x34b   :  { %1290 = vst [vmem:[#allocation5 + $0x138] sm:$0xff] %v1226_v24  ;;  %1289 = vst [vmem:[#allocation5 + $0x130] sm:$0xff] %v1225_v16  ;;  %v1928_v24 = vld [vmem:[#allocation18_spill] sm:$0xff]  ;;  %v1929_v16 = vld [vmem:[#allocation19_spill] sm:$0xff] }
 0x34c   :  { %v1083_v1 = vpop.permute.xlu1 %1082  ;;  %v1079_v34 = vpop.permute.xlu0 %1078 }
 0x34d   :  { %v1228_v11 = vmul.f32 %v1382_v42, %v1083_v1  ;;  %v1227_v41 = vmul.f32 %v1383_v39, %v1079_v34 }
 0x34f   :  { %1292 = vst [vmem:[#allocation5 + $0x148] sm:$0xff] %v1228_v11  ;;  %1291 = vst [vmem:[#allocation5 + $0x140] sm:$0xff] %v1227_v41  ;;  %v1390_v11 = vld [vmem:[#allocation2 + $0x8] sm:$0xff]  ;;  %v1391_v41 = vld [vmem:[#allocation2] sm:$0xff] }
 0x350   :  { %v1091_v20 = vpop.permute.xlu1 %1090  ;;  %v1087_v0 = vpop.permute.xlu0 %1086 }
 0x351   :  { %v1230_v23 = vmul.f32 %v1091_v20, %v1517_v35  ;;  %v1229_v27 = vmul.f32 %v1384_v26, %v1087_v0  ;;  %v1392_v26 = vld [vmem:[#allocation2 + $0x10] sm:$0xff] }
 0x353   :  { %1294 = vst [vmem:[#allocation5 + $0x158] sm:$0xff] %v1230_v23  ;;  %1293 = vst [vmem:[#allocation5 + $0x150] sm:$0xff] %v1229_v27 }
 0x354   :  { %v1102_v6 = vpop.permute.xlu1 %1101  ;;  %v1098_v13 = vpop.permute.xlu0 %1097 }
 0x355   :  { %v1232_v14 = vmul.f32 %v1385_v29, %v1102_v6  ;;  %v1231_v32 = vmul.f32 %v1386_v31, %v1098_v13  ;;  %v1393_v6 = vld [vmem:[#allocation2 + $0x20] sm:$0xff]  ;;  %v1394_v31 = vld [vmem:[#allocation2 + $0x18] sm:$0xff] }
 0x357   :  { %1296 = vst [vmem:[#allocation5 + $0x168] sm:$0xff] %v1232_v14  ;;  %1295 = vst [vmem:[#allocation5 + $0x160] sm:$0xff] %v1231_v32 }
 0x358   :  { %v1110_v33 = vpop.permute.xlu1 %1109  ;;  %v1106_v15 = vpop.permute.xlu0 %1105 }
 0x359   :  { %v1234_v8 = vmul.f32 %v1110_v33, %v1917_v3  ;;  %v1233_v59 = vmul.f32 %v1387_v9, %v1106_v15  ;;  %v1395_v33 = vld [vmem:[#allocation2 + $0x30] sm:$0xff]  ;;  %v1396_v9 = vld [vmem:[#allocation2 + $0x28] sm:$0xff] }
 0x35b   :  { %1298 = vst [vmem:[#allocation5 + $0x178] sm:$0xff] %v1234_v8  ;;  %1297 = vst [vmem:[#allocation5 + $0x170] sm:$0xff] %v1233_v59 }
 0x35c   :  { %v1121_v35 = vpop.permute.xlu1 %1120  ;;  %v1117_v58 = vpop.permute.xlu0 %1116 }
 0x35d   :  { %v1236_v57 = vmul.f32 %v1388_v19, %v1121_v35  ;;  %v1235_v22 = vmul.f32 %v1389_v45, %v1117_v58  ;;  %v1397_v35 = vld [vmem:[#allocation2 + $0x40] sm:$0xff]  ;;  %v1398_v45 = vld [vmem:[#allocation2 + $0x38] sm:$0xff] }
 0x35f   :  { %1300 = vst [vmem:[#allocation5 + $0x188] sm:$0xff] %v1236_v57  ;;  %1299 = vst [vmem:[#allocation5 + $0x180] sm:$0xff] %v1235_v22 }
 0x360   :  { %v1129_v25 = vpop.permute.xlu1 %1128  ;;  %v1125_v10 = vpop.permute.xlu0 %1124 }
 0x361   :  { %v1238_v4 = vmul.f32 %v1129_v25, %v1918_v21  ;;  %v1237_v28 = vmul.f32 %v1125_v10, %v1919_v60  ;;  %v1399_v25 = vld [vmem:[#allocation2 + $0x50] sm:$0xff]  ;;  %v1400_v60 = vld [vmem:[#allocation2 + $0x48] sm:$0xff] }
 0x363   :  { %1302 = vst [vmem:[#allocation5 + $0x198] sm:$0xff] %v1238_v4  ;;  %1301 = vst [vmem:[#allocation5 + $0x190] sm:$0xff] %v1237_v28 }
 0x364   :  { %v1140_v43 = vpop.permute.xlu1 %1139  ;;  %v1136_v17 = vpop.permute.xlu0 %1135 }
 0x365   :  { %v1240_v61 = vmul.f32 %v1140_v43, %v1920_v46  ;;  %v1239_v30 = vmul.f32 %v1136_v17, %v1921_v53  ;;  %v1401_v43 = vld [vmem:[#allocation2 + $0x60] sm:$0xff]  ;;  %v1402_v53 = vld [vmem:[#allocation2 + $0x58] sm:$0xff] }
 0x367   :  { %1304 = vst [vmem:[#allocation5 + $0x1a8] sm:$0xff] %v1240_v61  ;;  %1303 = vst [vmem:[#allocation5 + $0x1a0] sm:$0xff] %v1239_v30 }
 0x368   :  { %v1148_v52 = vpop.permute.xlu1 %1147  ;;  %v1144_v18 = vpop.permute.xlu0 %1143 }
 0x369   :  { %v1242_v51 = vmul.f32 %v1148_v52, %v1922_v50  ;;  %v1241_v2 = vmul.f32 %v1144_v18, %v1923_v5  ;;  %v1403_v52 = vld [vmem:[#allocation2 + $0x70] sm:$0xff]  ;;  %v1404_v5 = vld [vmem:[#allocation2 + $0x68] sm:$0xff] }
 0x36b   :  { %1306 = vst [vmem:[#allocation5 + $0x1b8] sm:$0xff] %v1242_v51  ;;  %1305 = vst [vmem:[#allocation5 + $0x1b0] sm:$0xff] %v1241_v2 }
 0x36c   :  { %v1159_v36 = vpop.permute.xlu1 %1158  ;;  %v1155_v37 = vpop.permute.xlu0 %1154 }
 0x36d   :  { %v1244_v44 = vmul.f32 %v1159_v36, %v1924_v38  ;;  %v1243_v47 = vmul.f32 %v1155_v37, %v1925_v40  ;;  %v1405_v36 = vld [vmem:[#allocation2 + $0x80] sm:$0xff]  ;;  %v1406_v40 = vld [vmem:[#allocation2 + $0x78] sm:$0xff] }
 0x36f   :  { %1308 = vst [vmem:[#allocation5 + $0x1c8] sm:$0xff] %v1244_v44  ;;  %1307 = vst [vmem:[#allocation5 + $0x1c0] sm:$0xff] %v1243_v47 }
 0x370   :  { %v1167_v49 = vpop.permute.xlu1 %1166  ;;  %v1163_v63 = vpop.permute.xlu0 %1162 }
 0x371   :  { %v1246_v48 = vmul.f32 %v1167_v49, %v1926_v62  ;;  %v1245_v56 = vmul.f32 %v1163_v63, %v1927_v54  ;;  %v1407_v49 = vld [vmem:[#allocation2 + $0x90] sm:$0xff]  ;;  %v1408_v54 = vld [vmem:[#allocation2 + $0x88] sm:$0xff] }
 0x373   :  { %1310 = vst [vmem:[#allocation5 + $0x1d8] sm:$0xff] %v1246_v48  ;;  %1309 = vst [vmem:[#allocation5 + $0x1d0] sm:$0xff] %v1245_v56 }
 0x374   :  { %v1178_v7 = vpop.permute.xlu1 %1177  ;;  %v1174_v55 = vpop.permute.xlu0 %1173 }
 0x375   :  { %v1248_v12 = vmul.f32 %v1178_v7, %v1928_v24  ;;  %v1247_v1 = vmul.f32 %v1174_v55, %v1929_v16  ;;  %v1409_v7 = vld [vmem:[#allocation2 + $0xa0] sm:$0xff]  ;;  %v1410_v16 = vld [vmem:[#allocation2 + $0x98] sm:$0xff] }
 0x377   :  { %1312 = vst [vmem:[#allocation5 + $0x1e8] sm:$0xff] %v1248_v12  ;;  %1311 = vst [vmem:[#allocation5 + $0x1e0] sm:$0xff] %v1247_v1 }
 0x378   :  { %v893_v34 = vpop.permute.xlu1 %892  ;;  %v889_v42 = vpop.permute.xlu0 %888 }
 0x379   :  { %v1188_v39 = vmul.f32 %v1390_v11, %v893_v34  ;;  %v1187_v20 = vmul.f32 %v1391_v41, %v889_v42  ;;  %v1411_v34 = vld [vmem:[#allocation2 + $0xb0] sm:$0xff]  ;;  %v1412_v41 = vld [vmem:[#allocation2 + $0xa8] sm:$0xff] }
 0x37b   :  { %1252 = vst [vmem:[#allocation5 + $0x8] sm:$0xff] %v1188_v39  ;;  %1251 = vst [vmem:[#allocation5] sm:$0xff] %v1187_v20 }
 0x37c   :  { %v897_v0 = vpop.permute.xlu1 %896  ;;  %v908_v23 = vpop.permute.xlu0 %907 }
 0x37d   :  { %v1189_v27 = vmul.f32 %v1392_v26, %v897_v0  ;;  %v1191_v13 = vmul.f32 %v1393_v6, %v908_v23  ;;  %v1413_v0 = vld [vmem:[#allocation2 + $0xc0] sm:$0xff]  ;;  %v1414_v6 = vld [vmem:[#allocation2 + $0xb8] sm:$0xff] }
 0x37f   :  { %1253 = vst [vmem:[#allocation5 + $0x10] sm:$0xff] %v1189_v27  ;;  %1255 = vst [vmem:[#allocation5 + $0x20] sm:$0xff] %v1191_v13 }
 0x380   :  { %v901_v29 = vpop.permute.xlu1 %900  ;;  %v916_v14 = vpop.permute.xlu0 %915 }
 0x381   :  { %v1190_v32 = vmul.f32 %v1394_v31, %v901_v29  ;;  %v1193_v15 = vmul.f32 %v1395_v33, %v916_v14  ;;  %v1415_v29 = vld [vmem:[#allocation2 + $0xd0] sm:$0xff]  ;;  %v1416_v33 = vld [vmem:[#allocation2 + $0xc8] sm:$0xff] }
 0x383   :  { %1254 = vst [vmem:[#allocation5 + $0x18] sm:$0xff] %v1190_v32  ;;  %1257 = vst [vmem:[#allocation5 + $0x30] sm:$0xff] %v1193_v15 }
 0x384   :  { %v912_v3 = vpop.permute.xlu1 %911  ;;  %v927_v8 = vpop.permute.xlu0 %926 }
 0x385   :  { %v1192_v59 = vmul.f32 %v1396_v9, %v912_v3  ;;  %v1195_v58 = vmul.f32 %v1397_v35, %v927_v8  ;;  %v1417_v3 = vld [vmem:[#allocation2 + $0xe0] sm:$0xff]  ;;  %v1418_v35 = vld [vmem:[#allocation2 + $0xd8] sm:$0xff] }
 0x387   :  { %1256 = vst [vmem:[#allocation5 + $0x28] sm:$0xff] %v1192_v59  ;;  %1259 = vst [vmem:[#allocation5 + $0x40] sm:$0xff] %v1195_v58 }
 0x388   :  { %v920_v19 = vpop.permute.xlu1 %919  ;;  %v935_v57 = vpop.permute.xlu0 %934 }
 0x389   :  { %v1194_v22 = vmul.f32 %v1398_v45, %v920_v19  ;;  %v1197_v10 = vmul.f32 %v1399_v25, %v935_v57  ;;  %v1419_v19 = vld [vmem:[#allocation2 + $0xf0] sm:$0xff]  ;;  %v1420_v25 = vld [vmem:[#allocation2 + $0xe8] sm:$0xff] }
 0x38b   :  { %1258 = vst [vmem:[#allocation5 + $0x38] sm:$0xff] %v1194_v22  ;;  %1261 = vst [vmem:[#allocation5 + $0x50] sm:$0xff] %v1197_v10 }
 0x38c   :  { %v931_v21 = vpop.permute.xlu1 %930  ;;  %v946_v4 = vpop.permute.xlu0 %945 }
 0x38d   :  { %v1196_v28 = vmul.f32 %v1400_v60, %v931_v21  ;;  %v1199_v17 = vmul.f32 %v1401_v43, %v946_v4  ;;  %v1421_v21 = vld [vmem:[#allocation2 + $0x1f0] sm:$0xff] }
 0x38f   :  { %1260 = vst [vmem:[#allocation5 + $0x48] sm:$0xff] %v1196_v28  ;;  %1263 = vst [vmem:[#allocation5 + $0x60] sm:$0xff] %v1199_v17  ;;  %v1422_v28 = vld [vmem:[#allocation2 + $0xf8] sm:$0xff] }
 0x390   :  { %v939_v46 = vpop.permute.xlu1 %938  ;;  %v954_v61 = vpop.permute.xlu0 %953 }
 0x391   :  { %v1198_v30 = vmul.f32 %v1402_v53, %v939_v46  ;;  %v1201_v18 = vmul.f32 %v1403_v52, %v954_v61  ;;  %v1423_v46 = vld [vmem:[#allocation2 + $0x1f8] sm:$0xff] }
 0x393   :  { %1262 = vst [vmem:[#allocation5 + $0x58] sm:$0xff] %v1198_v30  ;;  %1265 = vst [vmem:[#allocation5 + $0x70] sm:$0xff] %v1201_v18 }
 0x394   :  { %v950_v50 = vpop.permute.xlu1 %949  ;;  %v965_v51 = vpop.permute.xlu0 %964 }
 0x395   :  { %v1200_v2 = vmul.f32 %v1404_v5, %v950_v50  ;;  %v1203_v37 = vmul.f32 %v1405_v36, %v965_v51 }
 0x397   :  { %1264 = vst [vmem:[#allocation5 + $0x68] sm:$0xff] %v1200_v2  ;;  %1267 = vst [vmem:[#allocation5 + $0x80] sm:$0xff] %v1203_v37 }
 0x398   :  { %v958_v38 = vpop.permute.xlu1 %957  ;;  %v973_v44 = vpop.permute.xlu0 %972 }
 0x399   :  { %v1202_v47 = vmul.f32 %v1406_v40, %v958_v38  ;;  %v1205_v63 = vmul.f32 %v1407_v49, %v973_v44 }
 0x39b   :  { %1266 = vst [vmem:[#allocation5 + $0x78] sm:$0xff] %v1202_v47  ;;  %1269 = vst [vmem:[#allocation5 + $0x90] sm:$0xff] %v1205_v63 }
 0x39c   :  { %v969_v62 = vpop.permute.xlu1 %968  ;;  %v984_v48 = vpop.permute.xlu0 %983 }
 0x39d   :  { %v1204_v56 = vmul.f32 %v1408_v54, %v969_v62  ;;  %v1207_v55 = vmul.f32 %v1409_v7, %v984_v48 }
 0x39f   :  { %1268 = vst [vmem:[#allocation5 + $0x88] sm:$0xff] %v1204_v56  ;;  %1271 = vst [vmem:[#allocation5 + $0xa0] sm:$0xff] %v1207_v55 }
 0x3a0   :  { %v977_v24 = vpop.permute.xlu1 %976  ;;  %v992_v12 = vpop.permute.xlu0 %991 }
 0x3a1   :  { %v1206_v1 = vmul.f32 %v1410_v16, %v977_v24  ;;  %v1209_v42 = vmul.f32 %v1411_v34, %v992_v12 }
 0x3a3   :  { %1270 = vst [vmem:[#allocation5 + $0x98] sm:$0xff] %v1206_v1  ;;  %1273 = vst [vmem:[#allocation5 + $0xb0] sm:$0xff] %v1209_v42 }
 0x3a4   :  { %v988_v11 = vpop.permute.xlu1 %987  ;;  %v1003_v39 = vpop.permute.xlu0 %1002 }
 0x3a5   :  { %v1208_v20 = vmul.f32 %v1412_v41, %v988_v11  ;;  %v1211_v23 = vmul.f32 %v1413_v0, %v1003_v39 }
 0x3a7   :  { %1272 = vst [vmem:[#allocation5 + $0xa8] sm:$0xff] %v1208_v20  ;;  %1275 = vst [vmem:[#allocation5 + $0xc0] sm:$0xff] %v1211_v23 }
 0x3a8   :  { %v996_v26 = vpop.permute.xlu1 %995  ;;  %v1011_v27 = vpop.permute.xlu0 %1010 }
 0x3a9   :  { %v1210_v13 = vmul.f32 %v1414_v6, %v996_v26  ;;  %v1213_v14 = vmul.f32 %v1415_v29, %v1011_v27 }
 0x3ab   :  { %1274 = vst [vmem:[#allocation5 + $0xb8] sm:$0xff] %v1210_v13  ;;  %1277 = vst [vmem:[#allocation5 + $0xd0] sm:$0xff] %v1213_v14 }
 0x3ac   :  { %v1007_v31 = vpop.permute.xlu1 %1006  ;;  %v1022_v32 = vpop.permute.xlu0 %1021 }
 0x3ad   :  { %v1212_v15 = vmul.f32 %v1416_v33, %v1007_v31  ;;  %v1215_v8 = vmul.f32 %v1417_v3, %v1022_v32 }
 0x3af   :  { %1276 = vst [vmem:[#allocation5 + $0xc8] sm:$0xff] %v1212_v15  ;;  %1279 = vst [vmem:[#allocation5 + $0xe0] sm:$0xff] %v1215_v8 }
 0x3b0   :  { %v1015_v9 = vpop.permute.xlu1 %1014  ;;  %v1030_v59 = vpop.permute.xlu0 %1029 }
 0x3b1   :  { %v1214_v58 = vmul.f32 %v1418_v35, %v1015_v9  ;;  %v1217_v57 = vmul.f32 %v1419_v19, %v1030_v59 }
 0x3b3   :  { %1278 = vst [vmem:[#allocation5 + $0xd8] sm:$0xff] %v1214_v58  ;;  %1281 = vst [vmem:[#allocation5 + $0xf0] sm:$0xff] %v1217_v57 }
 0x3b4   :  { %v1026_v45 = vpop.permute.xlu1 %1025  ;;  %v1182_v22 = vpop.permute.xlu0 %1181 }
 0x3b5   :  { %v1216_v10 = vmul.f32 %v1420_v25, %v1026_v45  ;;  %v1249_v4 = vmul.f32 %v1421_v21, %v1182_v22 }
 0x3b7   :  { %1280 = vst [vmem:[#allocation5 + $0xe8] sm:$0xff] %v1216_v10  ;;  %1313 = vst [vmem:[#allocation5 + $0x1f0] sm:$0xff] %v1249_v4 }
 0x3b8   :  { %v1034_v60 = vpop.permute.xlu1 %1033 }
 0x3b9   :  { %v1218_v43 = vmul.f32 %v1422_v28, %v1034_v60 }
 0x3bb   :  { %1282 = vst [vmem:[#allocation5 + $0xf8] sm:$0xff] %v1218_v43 }
 0x3bc   :  { %v1186_v17 = vpop.permute.xlu1 %1185 }
 0x3bd   :  { %v1250_v61 = vmul.f32 %v1423_v46, %v1186_v17 }
 0x3bf   :  { %1314 = vst [vmem:[#allocation5 + $0x1f8] sm:$0xff] %v1250_v61 }
 0x3c0   :  { %1455 = shalt.err (!%p1452_p9)
}
 0x3c1   :  { %1326 = dma.vmem_to_hbm [thread:$0]  %s1321_s3, 8192, %s1890_s5, [#allocation4], %s1469_s21, %s1469_s21, %s1470_s22  }
 0x3c2   :  { %1466 = dma.done.wait [#allocation4], 8192  }
 0x3c3   :  { %1467 = vsyncadd [#allocation4], 4294959104 }
 0x3c4   :  { %1330 = vsyncpa [#allocation3], 1 }
 0x3c5   :  { %1331 = vsyncpa [#allocation4], 1 }

</bundles_post_ra>
